<compile_context>
chip_gen: v5e
topology: v5e:2x2
jax: 0.10.0
libtpu: 0.0.40
codegen_flags: <defaults>
</compile_context>

<pallas_src>
import functools

import jax
import jax.numpy as jnp
from jax.experimental import pallas as pl
from jax.experimental.pallas import tpu as pltpu


def _ce_kernel(logits_ref, target_ref, sum_ref, cnt_ref, acc_sum, acc_cnt,
               *, s_total, tile_s):
    """One (n, j) grid step: masked CE partials for a (C, tile_s) logits slab.

    logits_ref: (1, C, tile_s)   native channel-first block (spatial on lanes)
    target_ref: (1, 1, tile_s)   int32 labels (-1 = ignore)
    sum_ref / cnt_ref: (1, 1, 128) per-batch outputs (written on last j)
    acc_sum / acc_cnt: (1, tile_s) f32 VMEM accumulators (persist across j)
    """
    j = pl.program_id(1)

    @pl.when(j == 0)
    def _():
        acc_sum[...] = jnp.zeros_like(acc_sum)
        acc_cnt[...] = jnp.zeros_like(acc_cnt)

    x = logits_ref[0].astype(jnp.float32)      # (C, tile_s) — upcast in-kernel
    t = target_ref[0]                          # (1, tile_s) int32

    # numerically stable log-softmax over the channel (sublane) axis
    m = jnp.max(x, axis=0, keepdims=True)                              # (1, tile_s)
    lse = jnp.log(jnp.sum(jnp.exp(x - m), axis=0, keepdims=True)) + m  # (1, tile_s)

    # gather the logit at the target class via per-channel compare (C is small)
    ch = jax.lax.broadcasted_iota(jnp.int32, x.shape, 0)               # (C, tile_s)
    tgt_logit = jnp.sum(jnp.where(ch == t, x, 0.0), axis=0, keepdims=True)

    # mask: ignore_index == -1, plus lanes past the true spatial extent
    # (the ragged last tile reads unspecified data past s_total; mask it out)
    lane = jax.lax.broadcasted_iota(jnp.int32, t.shape, 1)             # (1, tile_s)
    in_bounds = (j * tile_s + lane) < s_total
    valid = (t != -1) & in_bounds

    acc_sum[...] += jnp.where(valid, lse - tgt_logit, 0.0)
    acc_cnt[...] += valid.astype(jnp.float32)

    @pl.when(j == pl.num_programs(1) - 1)
    def _():
        # cross-lane reduce once per batch element; broadcast over 128 lanes
        # so the output store is a full unmasked vst.
        sum_ref[...] = jnp.full(sum_ref.shape, jnp.sum(acc_sum[...]), jnp.float32)
        cnt_ref[...] = jnp.full(cnt_ref.shape, jnp.sum(acc_cnt[...]), jnp.float32)


def _masked_ce_mean(logits_ncs, target_n1s, *, tile_s=None,
                    max_block_bytes=4 * 1024 * 1024):
    """logits_ncs: (N, C, S) float; target_n1s: (N, 1, S) int32 (-1 = ignore)."""
    N, C, S = logits_ncs.shape
    itemsize = jnp.dtype(logits_ncs.dtype).itemsize

    if tile_s is None:
        # lane-dense spatial tile, capped by a per-block VMEM byte budget
        tile_cap = (max_block_bytes // (C * itemsize)) // 128 * 128
        tile_cap = max(128, min(32768, tile_cap))
        tile_s = S if S <= tile_cap else tile_cap
    grid_s = pl.cdiv(S, tile_s)

    kernel = functools.partial(_ce_kernel, s_total=S, tile_s=tile_s)

    sum_out, cnt_out = pl.pallas_call(
        kernel,
        out_shape=(
            jax.ShapeDtypeStruct((N, 1, 128), jnp.float32),
            jax.ShapeDtypeStruct((N, 1, 128), jnp.float32),
        ),
        grid_spec=pltpu.PrefetchScalarGridSpec(
            num_scalar_prefetch=0,
            grid=(N, grid_s),
            in_specs=[
                pl.BlockSpec((1, C, tile_s), lambda n, j: (n, 0, j)),
                pl.BlockSpec((1, 1, tile_s), lambda n, j: (n, 0, j)),
            ],
            out_specs=[
                pl.BlockSpec((1, 1, 128), lambda n, j: (n, 0, 0)),
                pl.BlockSpec((1, 1, 128), lambda n, j: (n, 0, 0)),
            ],
            scratch_shapes=[
                pltpu.VMEM((1, tile_s), jnp.float32),
                pltpu.VMEM((1, tile_s), jnp.float32),
            ],
        ),
        compiler_params=pltpu.CompilerParams(
            dimension_semantics=("parallel", "arbitrary"),
            vmem_limit_bytes=64 * 1024 * 1024),
    )(logits_ncs, target_n1s)

    total = jnp.sum(sum_out[:, 0, 0])
    count = jnp.sum(cnt_out[:, 0, 0])
    # reduction='elementwise_mean': sum over valid / #valid (NaN if none valid,
    # matching torch CrossEntropyLoss behavior)
    return (total / count).astype(jnp.float32)


def _scale_target_nearest(target, out_size):
    """PyTorch F.interpolate(mode='nearest') on an integer label volume.

    target: (N, D0, H0, W0) int  ->  (N, D, H, W) int  (out_size = (D, H, W))
    """
    N, D0, H0, W0 = target.shape
    D, H, W = out_size
    # torch 'nearest': src = floor(dst * in/out)
    di = jnp.clip(jnp.floor(jnp.arange(D) * (D0 / D)).astype(jnp.int32), 0, D0 - 1)
    hi = jnp.clip(jnp.floor(jnp.arange(H) * (H0 / H)).astype(jnp.int32), 0, H0 - 1)
    wi = jnp.clip(jnp.floor(jnp.arange(W) * (W0 / W)).astype(jnp.int32), 0, W0 - 1)
    t = target[:, di, :, :]
    t = t[:, :, hi, :]
    t = t[:, :, :, wi]
    return t


@functools.partial(jax.jit, static_argnames=("tile_s",))
def fsce_loss(logits, target, *, tile_s=None):
    """FSCELoss forward (single-tensor branch).

    logits: (N, C, D, H, W) float   (PyTorch NCDHW layout; bf16 or f32)
    target: (N, 1, D0, H0, W0) int  (labels; -1 = ignore)
    """
    N, C, D, H, W = logits.shape
    tgt = target[:, 0]                                                # squeeze(1)
    tgt = _scale_target_nearest(tgt, (D, H, W)).astype(jnp.int32)     # (N, D, H, W)

    S = D * H * W
    logits_ncs = logits.reshape(N, C, S)    # free reshape, no transpose/pad
    target_n1s = tgt.reshape(N, 1, S)

    return _masked_ce_mean(logits_ncs, target_n1s, tile_s=tile_s)
    # TODO(synk): the tuple/list multi-scale branch of FSCELoss (weighted sum of
    # per-scale CE losses) is a trivial wrapper loop over this kernel; not
    # exercised here.


def _reference_loss(logits, target):
    N, C, D, H, W = logits.shape
    tgt = _scale_target_nearest(target[:, 0], (D, H, W)).astype(jnp.int32)
    x = jnp.transpose(logits, (0, 2, 3, 4, 1)).reshape(-1, C).astype(jnp.float32)
    t = tgt.reshape(-1)
    logp = jax.nn.log_softmax(x, axis=-1)
    valid = t != -1
    nll = -jnp.take_along_axis(logp, jnp.clip(t, 0, C - 1)[:, None], axis=-1)[:, 0]
    return jnp.sum(jnp.where(valid, nll, 0.0)) / jnp.sum(valid)


if __name__ == "__main__":
    key = jax.random.PRNGKey(0)

    # Case 1: small volume, single exact tile per batch element.
    k1, k2, k3, k4 = jax.random.split(key, 4)
    N, C, D, H, W = 2, 4, 4, 8, 8           # logits (N, C, D, H, W); S = 256
    D0, H0, W0 = 2, 4, 4                    # coarser target volume
    logits = jax.random.normal(k1, (N, C, D, H, W), dtype=jnp.float32)
    target = jax.random.randint(k2, (N, 1, D0, H0, W0), minval=-1, maxval=C,
                                dtype=jnp.int32)          # includes ignore=-1

    loss = fsce_loss(logits, target)
    jax.block_until_ready(loss)
    ref = _reference_loss(logits, target)
    assert jnp.allclose(loss, ref, atol=1e-5, rtol=1e-5), (loss, ref)

    # Case 2: ragged last tile (S=192 not a multiple of forced tile 128) and
    # C=5 (non-multiple-of-8 channel count) to exercise the masking path.
    N2, C2, D2, H2, W2 = 2, 5, 3, 8, 8      # S = 192
    logits2 = jax.random.normal(k3, (N2, C2, D2, H2, W2), dtype=jnp.float32)
    target2 = jax.random.randint(k4, (N2, 1, 2, 4, 4), minval=-1, maxval=C2,
                                 dtype=jnp.int32)

    loss2 = fsce_loss(logits2, target2, tile_s=128)
    jax.block_until_ready(loss2)
    ref2 = _reference_loss(logits2, target2)
    assert jnp.allclose(loss2, ref2, atol=1e-5, rtol=1e-5), (loss2, ref2)

    print("KERNEL_OK")
</pallas_src>

<mosaic_0001>
module attributes {stable_mosaic.version = 11 : i64} {
  func.func @_ce_kernel(%arg0: i32, %arg1: i32, %arg2: memref<1x4x256xf32, #tpu.memory_space<vmem>>, %arg3: memref<1x1x256xi32, #tpu.memory_space<vmem>>, %arg4: memref<1x1x128xf32, #tpu.memory_space<vmem>>, %arg5: memref<1x1x128xf32, #tpu.memory_space<vmem>>, %arg6: memref<1x256xf32, #tpu.memory_space<vmem>>, %arg7: memref<1x256xf32, #tpu.memory_space<vmem>>) attributes {dimension_semantics = [#tpu.dimension_semantics<parallel>, #tpu.dimension_semantics<arbitrary>], iteration_bounds = array<i64: 2, 1>, scalar_prefetch = 0 : i64, scratch_operands = 2 : i64, tpu.core_type = #tpu.core_type<tc>, window_params = [{transform_indices = @transform_0, window_bounds = array<i64: 1, 4, 256>}, {transform_indices = @transform_1, window_bounds = array<i64: 1, 1, 256>}, {transform_indices = @transform_2, window_bounds = array<i64: 1, 1, 128>}, {transform_indices = @transform_3, window_bounds = array<i64: 1, 1, 128>}]} {
    %c0_i32 = arith.constant 0 : i32
    %0 = arith.cmpi eq, %arg1, %c0_i32 : i32
    %1 = arith.extui %0 : i1 to i32
    %c0_i32_0 = arith.constant 0 : i32
    %2 = arith.cmpi ne, %1, %c0_i32_0 : i32
    scf.if %2 {
      %cst_21 = arith.constant 0.000000e+00 : f32
      %46 = vector.broadcast %cst_21 : f32 to vector<1x256xf32>
      %c0_22 = arith.constant 0 : index
      %c0_23 = arith.constant 0 : index
      %47 = vector.load %arg6[%c0_22, %c0_23] : memref<1x256xf32, #tpu.memory_space<vmem>>, vector<1x256xf32>
      tpu.vector_store %arg6[%c0_22, %c0_23], %46 {strides = array<i32>} : memref<1x256xf32, #tpu.memory_space<vmem>>, vector<1x256xf32>,
      %cst_24 = arith.constant 0.000000e+00 : f32
      %48 = vector.broadcast %cst_24 : f32 to vector<1x256xf32>
      %c0_25 = arith.constant 0 : index
      %c0_26 = arith.constant 0 : index
      %49 = vector.load %arg7[%c0_25, %c0_26] : memref<1x256xf32, #tpu.memory_space<vmem>>, vector<1x256xf32>
      tpu.vector_store %arg7[%c0_25, %c0_26], %48 {strides = array<i32>} : memref<1x256xf32, #tpu.memory_space<vmem>>, vector<1x256xf32>,
    } else {
    }
    %c0 = arith.constant 0 : index
    %c0_1 = arith.constant 0 : index
    %c0_2 = arith.constant 0 : index
    %3 = vector.load %arg2[%c0, %c0_1, %c0_2] : memref<1x4x256xf32, #tpu.memory_space<vmem>>, vector<1x4x256xf32>
    %4 = vector.shape_cast %3 : vector<1x4x256xf32> to vector<4x256xf32>
    %c0_3 = arith.constant 0 : index
    %c0_4 = arith.constant 0 : index
    %c0_5 = arith.constant 0 : index
    %5 = vector.load %arg3[%c0_3, %c0_4, %c0_5] : memref<1x1x256xi32, #tpu.memory_space<vmem>>, vector<1x1x256xi32>
    %6 = vector.shape_cast %5 : vector<1x1x256xi32> to vector<1x256xi32>
    %cst = arith.constant dense<0xFF800000> : vector<256xf32>
    %7 = vector.multi_reduction <maximumf>, %4, %cst [0] : vector<4x256xf32> to vector<256xf32>
    %8 = vector.shape_cast %7 : vector<256xf32> to vector<1x256xf32>
    %9 = vector.broadcast %8 : vector<1x256xf32> to vector<4x256xf32>
    %10 = arith.subf %4, %9 : vector<4x256xf32>
    %11 = math.exp %10 : vector<4x256xf32>
    %cst_6 = arith.constant dense<0.000000e+00> : vector<256xf32>
    %12 = vector.multi_reduction <add>, %11, %cst_6 [0] : vector<4x256xf32> to vector<256xf32>
    %13 = vector.shape_cast %12 : vector<256xf32> to vector<1x256xf32>
    %14 = math.log %13 : vector<1x256xf32>
    %15 = arith.addf %14, %8 : vector<1x256xf32>
    %16 = tpu.iota {dimensions = array<i32: 0>} : vector<4x256xi32>
    %17 = vector.broadcast %6 : vector<1x256xi32> to vector<4x256xi32>
    %18 = arith.cmpi eq, %16, %17 : vector<4x256xi32>
    %cst_7 = arith.constant 0.000000e+00 : f32
    %19 = vector.broadcast %cst_7 : f32 to vector<4x256xf32>
    %20 = arith.select %18, %4, %19 : vector<4x256xi1>, vector<4x256xf32>
    %cst_8 = arith.constant dense<0.000000e+00> : vector<256xf32>
    %21 = vector.multi_reduction <add>, %20, %cst_8 [0] : vector<4x256xf32> to vector<256xf32>
    %22 = vector.shape_cast %21 : vector<256xf32> to vector<1x256xf32>
    %23 = tpu.iota {dimensions = array<i32: 1>} : vector<1x256xi32>
    %c256_i32 = arith.constant 256 : i32
    %24 = arith.muli %arg1, %c256_i32 : i32
    %25 = vector.broadcast %24 : i32 to vector<1x256xi32>
    %26 = arith.addi %25, %23 : vector<1x256xi32>
    %c256_i32_9 = arith.constant 256 : i32
    %27 = vector.broadcast %c256_i32_9 : i32 to vector<1x256xi32>
    %28 = arith.cmpi slt, %26, %27 : vector<1x256xi32>
    %c-1_i32 = arith.constant -1 : i32
    %29 = vector.broadcast %c-1_i32 : i32 to vector<1x256xi32>
    %30 = arith.cmpi ne, %6, %29 : vector<1x256xi32>
    %31 = arith.andi %30, %28 : vector<1x256xi1>
    %c0_10 = arith.constant 0 : index
    %c0_11 = arith.constant 0 : index
    %32 = vector.load %arg6[%c0_10, %c0_11] : memref<1x256xf32, #tpu.memory_space<vmem>>, vector<1x256xf32>
    %33 = arith.subf %15, %22 : vector<1x256xf32>
    %cst_12 = arith.constant 0.000000e+00 : f32
    %34 = vector.broadcast %cst_12 : f32 to vector<1x256xf32>
    %35 = arith.select %31, %33, %34 : vector<1x256xi1>, vector<1x256xf32>
    %36 = arith.addf %32, %35 : vector<1x256xf32>
    %c0_13 = arith.constant 0 : index
    %c0_14 = arith.constant 0 : index
    %37 = vector.load %arg6[%c0_13, %c0_14] : memref<1x256xf32, #tpu.memory_space<vmem>>, vector<1x256xf32>
    tpu.vector_store %arg6[%c0_13, %c0_14], %36 {strides = array<i32>} : memref<1x256xf32, #tpu.memory_space<vmem>>, vector<1x256xf32>,
    %c0_15 = arith.constant 0 : index
    %c0_16 = arith.constant 0 : index
    %38 = vector.load %arg7[%c0_15, %c0_16] : memref<1x256xf32, #tpu.memory_space<vmem>>, vector<1x256xf32>
    %39 = arith.extui %31 : vector<1x256xi1> to vector<1x256xi32>
    %40 = arith.sitofp %39 : vector<1x256xi32> to vector<1x256xf32>
    %41 = arith.addf %38, %40 : vector<1x256xf32>
    %c0_17 = arith.constant 0 : index
    %c0_18 = arith.constant 0 : index
    %42 = vector.load %arg7[%c0_17, %c0_18] : memref<1x256xf32, #tpu.memory_space<vmem>>, vector<1x256xf32>
    tpu.vector_store %arg7[%c0_17, %c0_18], %41 {strides = array<i32>} : memref<1x256xf32, #tpu.memory_space<vmem>>, vector<1x256xf32>,
    %c0_i32_19 = arith.constant 0 : i32
    %43 = arith.cmpi eq, %arg1, %c0_i32_19 : i32
    %44 = arith.extui %43 : i1 to i32
    %c0_i32_20 = arith.constant 0 : i32
    %45 = arith.cmpi ne, %44, %c0_i32_20 : i32
    scf.if %45 {
      %c0_21 = arith.constant 0 : index
      %c0_22 = arith.constant 0 : index
      %46 = vector.load %arg6[%c0_21, %c0_22] : memref<1x256xf32, #tpu.memory_space<vmem>>, vector<1x256xf32>
      %47 = vector.shape_cast %46 : vector<1x256xf32> to vector<1x1x256xf32>
      %cst_23 = arith.constant dense<0.000000e+00> : vector<1xf32>
      %48 = vector.multi_reduction <add>, %47, %cst_23 [1, 2] : vector<1x1x256xf32> to vector<1xf32>
      %49 = vector.shape_cast %48 : vector<1xf32> to vector<1x1x1xf32>
      %50 = vector.extract %49[0, 0, 0] : f32 from vector<1x1x1xf32>
      %51 = vector.broadcast %50 : f32 to vector<1x1x128xf32>
      %c0_24 = arith.constant 0 : index
      %c0_25 = arith.constant 0 : index
      %c0_26 = arith.constant 0 : index
      %52 = vector.load %arg4[%c0_24, %c0_25, %c0_26] : memref<1x1x128xf32, #tpu.memory_space<vmem>>, vector<1x1x128xf32>
      tpu.vector_store %arg4[%c0_24, %c0_25, %c0_26], %51 {strides = array<i32>} : memref<1x1x128xf32, #tpu.memory_space<vmem>>, vector<1x1x128xf32>,
      %c0_27 = arith.constant 0 : index
      %c0_28 = arith.constant 0 : index
      %53 = vector.load %arg7[%c0_27, %c0_28] : memref<1x256xf32, #tpu.memory_space<vmem>>, vector<1x256xf32>
      %54 = vector.shape_cast %53 : vector<1x256xf32> to vector<1x1x256xf32>
      %cst_29 = arith.constant dense<0.000000e+00> : vector<1xf32>
      %55 = vector.multi_reduction <add>, %54, %cst_29 [1, 2] : vector<1x1x256xf32> to vector<1xf32>
      %56 = vector.shape_cast %55 : vector<1xf32> to vector<1x1x1xf32>
      %57 = vector.extract %56[0, 0, 0] : f32 from vector<1x1x1xf32>
      %58 = vector.broadcast %57 : f32 to vector<1x1x128xf32>
      %c0_30 = arith.constant 0 : index
      %c0_31 = arith.constant 0 : index
      %c0_32 = arith.constant 0 : index
      %59 = vector.load %arg5[%c0_30, %c0_31, %c0_32] : memref<1x1x128xf32, #tpu.memory_space<vmem>>, vector<1x1x128xf32>
      tpu.vector_store %arg5[%c0_30, %c0_31, %c0_32], %58 {strides = array<i32>} : memref<1x1x128xf32, #tpu.memory_space<vmem>>, vector<1x1x128xf32>,
    } else {
    }
    return
  }
  func.func @transform_0(%arg0: i32, %arg1: i32) -> (i32, i32, i32) {
    %c0_i32 = arith.constant 0 : i32
    %c0_i32_0 = arith.constant 0 : i32
    return %arg0, %c0_i32, %arg1 : i32, i32, i32
  }
  func.func @transform_1(%arg0: i32, %arg1: i32) -> (i32, i32, i32) {
    %c0_i32 = arith.constant 0 : i32
    %c0_i32_0 = arith.constant 0 : i32
    return %arg0, %c0_i32, %arg1 : i32, i32, i32
  }
  func.func @transform_2(%arg0: i32, %arg1: i32) -> (i32, i32, i32) {
    %c0_i32 = arith.constant 0 : i32
    %c0_i32_0 = arith.constant 0 : i32
    %c0_i32_1 = arith.constant 0 : i32
    return %arg0, %c0_i32, %c0_i32_0 : i32, i32, i32
  }
  func.func @transform_3(%arg0: i32, %arg1: i32) -> (i32, i32, i32) {
    %c0_i32 = arith.constant 0 : i32
    %c0_i32_0 = arith.constant 0 : i32
    %c0_i32_1 = arith.constant 0 : i32
    return %arg0, %c0_i32, %c0_i32_0 : i32, i32, i32
  }
}

</mosaic_0001>

<bundles_post_ra>
// kernel: fsce_loss.1
= control target key start
LH: loop header
LB: loop body
LE: loop exit
PB: predicated region body
PF: predicated region fallthrough
CT: control target
= control target key end

     0   :  { %s606_s12 = smov 0   ;;  %s608_s13 = smov 0   ;;  %s692_s0 = inlined_call_operand.vmem [shape: f32[2,4,256], index: 0, kind: input, shape index: {}]   ;;  %s693_s1 = inlined_call_operand.vmem [shape: s32[2,1,256], index: 1, kind: input, shape index: {}]   ;;  %s694_s2 = inlined_call_operand.vmem [shape: f32[2,1,128], index: 2, kind: output, shape index: {0}]   ;;  %s695_s3 = inlined_call_operand.vmem [shape: f32[2,1,128], index: 3, kind: output, shape index: {1}]  }
   0x1   :  { %s610_s14 = smov 0  }
   0x2 LB: > { %s26_s15 = sadd.s32 1, %s578_s13  ;;  %p516_p0 = scmp.ge.s32.totalorder %s582_s14, 1  ;;  %s582_s14 = sphi %s610_s14, %s14_s14   ;;  %s578_s13 = sphi %s608_s13, %s701_s13   ;;  %s574_s12 = sphi %s606_s12, %s700_s12  }
   0x3   : > { %p28_p1 = scmp.ge.s32.totalorder %s26_s15, 2  ;;  %p175_p2 = scmp.lt.s32.totalorder %s582_s14, 3 }
   0x5   : > { %s703_s15 = smov (%p28_p1, %s26_s15), 0  ;;  %p176_p3 = pnand %p516_p0, %p175_p2 }
   0x6   : > { %p213_p4 = scmp.lt.s32.totalorder (!%p176_p3), %s574_s12, 1 }
   0x7   : > { %179 = sbr.rel (%p176_p3) target bundleno = 294 (0x126), region = 28 }
   0xc   : > { %v241_v0 = vlaneseq  ;;  %s705_s12 = smov (!%p213_p4, %s574_s12), 1  ;;  %v584_v2 = vmov 0.0   ;;  %vm255_vm1 = vcmask 1043456   ;;  %vm344_vm2 = vcmask 1040384  }
   0xd   : > { %s523_s16 = sshll.u32 %s705_s12, 3  ;;  %s519_s20 = sshll.u32 %s705_s12, 1  ;;  %v585_v25 = vmov 1  }
   0xe   : > { %vm626_vm0 = vcmp.lt.s32.totalorder %v241_v0, 256  ;;  %s220_s19 = scalar_lea.vmem %s692_s0, %s523_s16  ;;  %v343_v26 = vrot.slane %v585_v25, 7  ;;  %s229_s23 = scalar_lea.vmem %s693_s1, %s519_s20  ;;  %v305_v33 = vshrl.u32 %v241_v0, 7 }
   0xf   : > { %245 = vst.msk [vmem:[#allocation2] sm:$0x3] %vm626_vm0, %v584_v2  ;;  %v247_v3 = vld [vmem:[%s220_s19] sm:$0xff]  ;;  %s233_s26 = scalar_lea.vmem %s694_s2, %s705_s12  ;;  %s236_s30 = scalar_lea.vmem %s695_s3, %s705_s12 }
  0x10   : > { %246 = vst.msk [vmem:[#allocation3] sm:$0x3] %vm626_vm0, %v584_v2  ;;  %v345_v27 = vsel %vm344_vm2, 1, %v343_v26  ;;  %v248_v28 = vld [vmem:[%s229_s23] sm:$0x3] }
  0x11   : > { %250 = vst [vmem:[#allocation1] ss:$2 sm:$0xff] %v247_v3  ;;  %vm340_vm3 = vcmp.ne.s32.totalorder %v248_v28, 4294967295  ;;  %vm346_vm4 = vcmp.ne.s32.totalorder %v345_v27, 0  ;;  %v307_v34 = vperm.slane %v248_v28, 1  ;;  %v306_v38 = vperm.slane %v248_v28, 0 }
  0x12   : > { %vm654_vm5 = vmand %vm340_vm3, %vm346_vm4 }
  0x13   : > { %v520_v40 = vsel %vm654_vm5, 1.0, %v584_v2  ;;  %vm308_vm6 = vcmp.eq.s32.totalorder %v305_v33, %v306_v38  ;;  %vm309_vm7 = vcmp.eq.s32.totalorder %v305_v33, %v307_v34 }
  0x17   : > { %v363_v39 = vld [vmem:[#allocation3] sm:$0x3] }
  0x18   : > { %v251_v4 = vld.sshfl [vmem:[#allocation1] sm:$0xff pattern:$0x75316420]  ;;  %v252_v5 = vld.sshfl [vmem:[#allocation1 + $0x8] sm:$0xff pattern:$0x75316420]  ;;  %v366_v41 = vadd.f32 %v520_v40, %v363_v39 }
  0x19   : > { %v256_v6 = vsel %vm255_vm1, %v251_v4, -inf  ;;  %v263_v7 = vsel %vm255_vm1, %v252_v5, -inf }
  0x1a   : > { %v257_v8 = vrot.slane %v256_v6, 4  ;;  %v264_v9 = vrot.slane %v263_v7, 4  ;;  %367 = vst.msk [vmem:[#allocation3] sm:$0x3] %vm626_vm0, %v366_v41 }
  0x1c   : > { %v258_v10 = vmax.f32 %v256_v6, %v257_v8  ;;  %v265_v11 = vmax.f32 %v263_v7, %v264_v9 }
  0x1e   : > { %v259_v12 = vrot.slane %v258_v10, 2  ;;  %v266_v13 = vrot.slane %v265_v11, 2 }
  0x20   : > { %v260_v14 = vmax.f32 %v258_v10, %v259_v12  ;;  %v267_v15 = vmax.f32 %v265_v11, %v266_v13 }
  0x22   : > { %v261_v16 = vrot.slane %v260_v14, 1  ;;  %v268_v17 = vrot.slane %v267_v15, 1 }
  0x24   : > { %v640_v18 = vmax.f32 %v260_v14, %v261_v16  ;;  %v642_v19 = vmax.f32 %v267_v15, %v268_v17  ;;  %v348_v16 = vld [vmem:[#allocation2] sm:$0x3] }
  0x26   : > { %v272_v20 = vrot.slane %v642_v19, 4 }
  0x28   : > { %v273_v21 = vsel %vm255_vm1, %v640_v18, %v272_v20 }
  0x29   : > { %v275_v22 = vsub.f32 %v247_v3, %v273_v21 }
  0x2b   : > { %v276_v23 = vmul.f32 1.442695, %v275_v22 }
  0x2d   : > { %554 = vpow2.f32 %v276_v23  ;;  %v391_v23 = vld [vmem:[#allocation3] sm:$0x3] }
  0x2e   : > { %v393_v26 = vperm.slane %v391_v23, 0  ;;  %v394_v27 = vperm.slane %v391_v23, 1 }
  0x33   : > { %v555_v24 = vpop.eup %554 }
  0x34   : > { %279 = vst [vmem:[#allocation1] ss:$2 sm:$0xff] %v555_v24 }
  0x3b   : > { %v280_v29 = vld.sshfl [vmem:[#allocation1] sm:$0xff pattern:$0x75316420]  ;;  %v281_v30 = vld.sshfl [vmem:[#allocation1 + $0x8] sm:$0xff pattern:$0x75316420] }
  0x3c   : > { %v284_v31 = vsel %vm255_vm1, %v280_v29, 0.0  ;;  %v291_v32 = vsel %vm255_vm1, %v281_v30, 0.0  ;;  %310 = vst [vmem:[#allocation1] ss:$2 sm:$0xff] %v247_v3  ;;  %v397_v29 = vsel %vm344_vm2, %v393_v26, 0.0  ;;  %v398_v30 = vsel %vm344_vm2, %v394_v27, 0.0 }
  0x3d   : > { %v285_v36 = vrot.slane %v284_v31, 4  ;;  %v292_v37 = vrot.slane %v291_v32, 4 }
  0x3f   : > { %v286_v42 = vadd.f32 %v285_v36, %v284_v31  ;;  %v293_v43 = vadd.f32 %v292_v37, %v291_v32  ;;  %v399_v31 = vadd.f32 %v398_v30, %v397_v29 }
  0x41   : > { %v287_v44 = vrot.slane %v286_v42, 2  ;;  %v294_v45 = vrot.slane %v293_v43, 2 }
  0x43   : > { %v288_v46 = vadd.f32 %v287_v44, %v286_v42  ;;  %v295_v47 = vadd.f32 %v294_v45, %v293_v43  ;;  %v311_v48 = vld.sshfl [vmem:[#allocation1] sm:$0xff pattern:$0x75316420]  ;;  %v312_v49 = vld.sshfl [vmem:[#allocation1 + $0x8] sm:$0xff pattern:$0x75316420] }
  0x44   : > { %v315_v50 = vsel %vm308_vm6, %v311_v48, 0.0  ;;  %v316_v51 = vsel %vm309_vm7, %v312_v49, 0.0 }
  0x45   : > { %v289_v52 = vrot.slane %v288_v46, 1  ;;  %v296_v53 = vrot.slane %v295_v47, 1  ;;  %v317_v54 = vsel %vm255_vm1, %v315_v50, 0.0  ;;  %v324_v55 = vsel %vm255_vm1, %v316_v51, 0.0 }
  0x46   : > { %v318_v56 = vrot.slane %v317_v54, 4  ;;  %v325_v57 = vrot.slane %v324_v55, 4 }
  0x47   : > { %v290_v58 = vadd.f32 %v289_v52, %v288_v46  ;;  %v297_v59 = vadd.f32 %v296_v53, %v295_v47 }
  0x48   : > { %v319_v60 = vadd.f32 %v318_v56, %v317_v54  ;;  %v326_v61 = vadd.f32 %v325_v57, %v324_v55 }
  0x49   : > { %556 = vlog2.f32 %v290_v58 }
  0x4a   : > { %558 = vlog2.f32 %v297_v59  ;;  %v320_v62 = vrot.slane %v319_v60, 2  ;;  %v327_v63 = vrot.slane %v326_v61, 2 }
  0x4c   : > { %v321_v0 = vadd.f32 %v320_v62, %v319_v60  ;;  %v328_v2 = vadd.f32 %v327_v63, %v326_v61 }
  0x4e   : > { %v322_v3 = vrot.slane %v321_v0, 1  ;;  %v329_v4 = vrot.slane %v328_v2, 1 }
  0x4f   : > { %v557_v5 = vpop.eup %556 }
  0x50   : > { %v559_v6 = vpop.eup %558  ;;  %v299_v7 = vmul.f32 0.6931472, %v557_v5  ;;  %v323_v9 = vadd.f32 %v322_v3, %v321_v0  ;;  %v330_v10 = vadd.f32 %v329_v4, %v328_v2 }
  0x51   : > { %v301_v8 = vmul.f32 0.6931472, %v559_v6 }
  0x52   : > { %v302_v11 = vadd.f32 %v299_v7, %v640_v18 }
  0x53   : > { %v303_v12 = vadd.f32 %v301_v8, %v642_v19 }
  0x54   : > { %v349_v13 = vsub.f32 %v302_v11, %v323_v9 }
  0x55   : > { %v350_v14 = vsub.f32 %v303_v12, %v330_v10 }
  0x57   : > { %v353_v15 = vrot.slane %v350_v14, 7 }
  0x59   : > { %v354_v17 = vsel %vm344_vm2, %v349_v13, %v353_v15 }
  0x5a   : > { %v356_v20 = vsel %vm654_vm5, %v354_v17, 0.0 }
  0x5b   : > { %v357_v21 = vadd.f32 %v356_v20, %v348_v16 }
  0x5d   : > { %362 = vst.msk [vmem:[#allocation2] sm:$0x3] %vm626_vm0, %v357_v21 }
  0x64   : > { %v371_v22 = vld [vmem:[#allocation2] sm:$0x3] }
  0x65   : > { %v373_v24 = vperm.slane %v371_v22, 0  ;;  %v374_v25 = vperm.slane %v371_v22, 1 }
  0x67   : > { %v377_v18 = vsel %vm344_vm2, %v373_v24, 0.0  ;;  %v378_v19 = vsel %vm344_vm2, %v374_v25, 0.0 }
  0x68   : > { %v379_v28 = vadd.f32 %v378_v19, %v377_v18 }
  0x6a   : > { %380 = vadd.xlane.f32.xlu0 %v379_v28 }
  0x72   : > { %400 = vadd.xlane.f32.xlu0 %v399_v31 }
  0xdd   : > { %v381_v1 = vpop.xlane.xlu0 %380 }
  0xde   : > { %v382_v32 = vrot.slane %v381_v1, 4 }
  0xe0   : > { %v383_v33 = vadd.f32 %v382_v32, %v381_v1 }
  0xe2   : > { %v384_v34 = vrot.slane %v383_v33, 2 }
  0xe4   : > { %v385_v35 = vadd.f32 %v384_v34, %v383_v33 }
  0xe5   : > { %v401_v36 = vpop.xlane.xlu0 %400 }
  0xe6   : > { %v402_v37 = vrot.slane %v401_v36, 4  ;;  %v386_v38 = vrot.slane %v385_v35, 1 }
  0xe8   : > { %v403_v39 = vadd.f32 %v402_v37, %v401_v36  ;;  %v387_v40 = vadd.f32 %v386_v38, %v385_v35 }
  0xea   : > { %v404_v41 = vrot.slane %v403_v39, 2  ;;  %524 = vpush %v387_v40 }
  0xec   : > { %v405_v42 = vadd.f32 %v404_v41, %v403_v39 }
  0xee   : > { %v406_v43 = vrot.slane %v405_v42, 1 }
  0xf0   : > { %v407_v44 = vadd.f32 %v406_v43, %v405_v42 }
  0xf2   : > { %526 = vpush %v407_v44 }
 0x11b   : > { %s525_s27 = spop %524 }
 0x11c   : > { %v389_v45 = vstv %s525_s27 }
 0x11d   : > { %390 = vst [vmem:[%s233_s26] sm:$0x1] %v389_v45 }
 0x123   : > { %s527_s4 = spop %526 }
 0x124   : > { %v409_v46 = vstv %s527_s4 }
 0x125   : > { %410 = vst [vmem:[%s236_s30] sm:$0x1] %v409_v46 }
 0x126 PF: > { %s14_s14 = sadd.s32 1, %s582_s14   ;;  %s700_s12 = smov %s578_s13 }
 0x127   : > { %p11_p5 = scmp.ge.s32.totalorder %s14_s14, 4   ;;  %s701_s13 = smov %s703_s15 }
 0x129   :  { %13 = sbr.rel (!%p11_p5) target bundleno = 2 (0x2), region = 81 }

</bundles_post_ra>
